<compile_context>
chip_gen: v6e
topology: v6e:2x2x1
jax: 0.10.0
libtpu: 0.0.40
codegen_flags: <defaults>
</compile_context>

<pallas_src>
import functools

import jax
import jax.numpy as jnp
from jax import lax
from jax.experimental import pallas as pl
from jax.experimental.pallas import tpu as pltpu

_MAX_TILE_N = 1024  # samples per grid step (multiple of 128); tiny VMEM footprint


def _round_up(x, m):
    return ((x + m - 1) // m) * m


def _fairness_loss_kernel(logits_ref, targets_ref, protected_ref, out_ref,
                          acc_ref, *, lambda_fair, fairness_type, n):
    pid = pl.program_id(0)
    n_tiles = pl.num_programs(0)

    @pl.when(pid == 0)
    def _init():
        acc_ref[...] = jnp.zeros_like(acc_ref)

    logits = logits_ref[...].astype(jnp.float32)           # (C, TN)
    targets = targets_ref[...]                              # (1, TN) int32
    prot_raw = protected_ref[...].astype(jnp.float32)       # (1, TN) 0/1
    C, TN = logits.shape

    # validity mask for padded columns (global sample index < n)
    lane = lax.broadcasted_iota(jnp.int32, (1, TN), 1)
    valid = ((pid * TN + lane) < n).astype(jnp.float32)      # (1, TN)

    # ---- per-sample cross entropy (reduction='none'), no log_probs tile ----
    maxv = jnp.max(logits, axis=0, keepdims=True)            # (1, TN)
    lse = jnp.log(jnp.sum(jnp.exp(logits - maxv), axis=0, keepdims=True))
    cls = lax.broadcasted_iota(jnp.int32, (C, TN), 0)
    one_hot = (cls == targets).astype(jnp.float32)
    tgt_logit = jnp.sum(one_hot * logits, axis=0, keepdims=True)
    base_loss = lse + maxv - tgt_logit                        # (1, TN)

    # preds = argmax(outputs, 1); pred == 1 with first-index semantics
    # (class-1 logit attains the row max AND class-0 logit is strictly below).
    # Requires C >= 2 (asserted in the wrapper).
    pred1 = jnp.logical_and(logits[1:2, :] >= maxv,
                            logits[0:1, :] < maxv).astype(jnp.float32)

    prot_v = prot_raw * valid
    pred_v = pred1 * valid
    pos_raw = (targets == 1).astype(jnp.float32)
    pos_v = pos_raw * valid

    # 8 running per-lane sums; all other group statistics are derived from
    # these (and the static n) in the finalize step.
    rows = (
        base_loss * valid,            # 0: sum base_loss
        pred_v,                       # 1: sum pred==1
        prot_v,                       # 2: count protected
        pred_v * prot_raw,            # 3: sum pred==1 & protected
        pos_v,                        # 4: count target==1
        pred_v * pos_raw,             # 5: sum pred==1 & target==1
        prot_v * pos_raw,             # 6: count protected & target==1
        pred_v * prot_raw * pos_raw,  # 7: sum pred==1 & protected & target==1
    )
    for k, r in enumerate(rows):
        acc_ref[k:k + 1, :] += r

    @pl.when(pid == n_tiles - 1)
    def _finalize():
        totals = jnp.sum(acc_ref[...], axis=1, keepdims=True)   # (8, 1)
        base_sum = totals[0:1, :]
        pred_sum = totals[1:2, :]
        prot_cnt = totals[2:3, :]
        prot_pred = totals[3:4, :]
        pos_cnt = totals[4:5, :]
        pos_pred = totals[5:6, :]
        pp_cnt = totals[6:7, :]
        pp_pred = totals[7:8, :]

        n_f = jnp.float32(n)
        mean_base = base_sum * jnp.float32(1.0 / n)

        unprot_cnt = n_f - prot_cnt
        unprot_pred = pred_sum - prot_pred

        def safe_mean(s, c):
            inv = pl.reciprocal(jnp.where(c > 0.0, c, 1.0), approx=False)
            return jnp.where(c > 0.0, s * inv, 0.0)

        if fairness_type == 'demographic_parity':
            fairness = jnp.abs(safe_mean(prot_pred, prot_cnt)
                               - safe_mean(unprot_pred, unprot_cnt))
        elif fairness_type == 'equalized_odds':
            pn_cnt = prot_cnt - pp_cnt       # protected & target!=1
            pn_pred = prot_pred - pp_pred
            up_cnt = pos_cnt - pp_cnt        # unprotected & target==1
            up_pred = pos_pred - pp_pred
            un_cnt = unprot_cnt - up_cnt     # unprotected & target!=1
            un_pred = unprot_pred - up_pred
            fairness = (jnp.abs(safe_mean(pp_pred, pp_cnt)
                                - safe_mean(up_pred, up_cnt))
                        + jnp.abs(safe_mean(pn_pred, pn_cnt)
                                  - safe_mean(un_pred, un_cnt)))
        else:
            raise ValueError(f'Unknown fairness type: {fairness_type}')

        both_groups = jnp.logical_and(prot_cnt > 0.0, unprot_cnt > 0.0)
        total = mean_base + jnp.where(both_groups, lambda_fair * fairness, 0.0)
        out_ref[...] = total.astype(jnp.float32)


def improved_fairness_loss(outputs, targets, protected_attrs,
                           fairness_type='demographic_parity',
                           lambda_fair=0.5, tile_n=None):
    """JAX/Pallas equivalent of ImprovedFairnessLoss.forward."""
    N, C = outputs.shape
    if C < 2:
        raise ValueError("ImprovedFairnessLoss requires at least 2 classes "
                         "(uses preds == 1).")

    if tile_n is None:
        tile_n = min(_MAX_TILE_N, _round_up(N, 128))
    tile_n = max(128, _round_up(int(tile_n), 128))
    n_pad = _round_up(N, tile_n)
    num_tiles = n_pad // tile_n
    pad = n_pad - N

    # Lane-dense layout: samples along lanes.
    logits_t = jnp.pad(jnp.transpose(outputs.astype(jnp.float32)),
                       ((0, 0), (0, pad)))                         # (C, n_pad)
    targets_row = jnp.pad(targets.astype(jnp.int32).reshape(1, N),
                          ((0, 0), (0, pad)))                      # (1, n_pad)
    prot_row = jnp.pad((protected_attrs.reshape(1, N) > 0.5).astype(jnp.int8),
                       ((0, 0), (0, pad)))                         # (1, n_pad)

    kernel = functools.partial(
        _fairness_loss_kernel,
        lambda_fair=float(lambda_fair),
        fairness_type=fairness_type,
        n=N,
    )
    out = pl.pallas_call(
        kernel,
        grid=(num_tiles,),
        in_specs=[
            pl.BlockSpec((C, tile_n), lambda i: (0, i)),
            pl.BlockSpec((1, tile_n), lambda i: (0, i)),
            pl.BlockSpec((1, tile_n), lambda i: (0, i)),
        ],
        out_specs=pl.BlockSpec((1, 1), lambda i: (0, 0)),
        out_shape=jax.ShapeDtypeStruct((1, 1), jnp.float32),
        scratch_shapes=[pltpu.VMEM((8, tile_n), jnp.float32)],
        compiler_params=pltpu.CompilerParams(
            dimension_semantics=("arbitrary",)),
    )(logits_t, targets_row, prot_row)
    return out[0, 0]


def _reference_loss(outputs, targets, protected_attrs,
                    fairness_type='demographic_parity', lambda_fair=0.5):
    """Pure-JAX reference mirroring the PyTorch forward (for validation)."""
    logits = outputs.astype(jnp.float32)
    log_probs = jax.nn.log_softmax(logits, axis=1)
    base_loss = -jnp.take_along_axis(
        log_probs, targets[:, None].astype(jnp.int32), axis=1)[:, 0]
    preds = jnp.argmax(logits, axis=1)
    mask_prot = (protected_attrs > 0.5).astype(jnp.float32)
    mask_unprot = 1.0 - mask_prot

    def safe_mean(vals, mask):
        c = jnp.sum(mask)
        return jnp.where(c > 0, jnp.sum(vals * mask) / jnp.where(c > 0, c, 1.0), 0.0)

    pred1 = (preds == 1).astype(jnp.float32)
    if fairness_type == 'demographic_parity':
        fairness = jnp.abs(safe_mean(pred1, mask_prot) - safe_mean(pred1, mask_unprot))
    else:
        pos = (targets == 1).astype(jnp.float32)
        neg = 1.0 - pos
        fairness = (jnp.abs(safe_mean(pred1, mask_prot * pos) -
                            safe_mean(pred1, mask_unprot * pos)) +
                    jnp.abs(safe_mean(pred1, mask_prot * neg) -
                            safe_mean(pred1, mask_unprot * neg)))
    both = jnp.logical_and(jnp.sum(mask_prot) > 0, jnp.sum(mask_unprot) > 0)
    return jnp.mean(base_loss) + jnp.where(both, lambda_fair * fairness, 0.0)


if __name__ == "__main__":
    key = jax.random.PRNGKey(0)
    k_out, k_tgt, k_out2, k_tgt2 = jax.random.split(key, 4)

    # --- small case (single tile) ---
    N, C = 8, 4
    outputs = jax.random.normal(k_out, (N, C), dtype=jnp.float32)
    targets = jax.random.randint(k_tgt, (N,), 0, C, dtype=jnp.int32)
    protected_attrs = jnp.array([1., 0., 1., 0., 1., 1., 0., 0.], dtype=jnp.float32)

    for ftype in ('demographic_parity', 'equalized_odds'):
        loss = improved_fairness_loss(outputs, targets, protected_attrs,
                                      fairness_type=ftype, lambda_fair=0.5)
        loss = jax.block_until_ready(loss)
        ref = _reference_loss(outputs, targets, protected_attrs,
                              fairness_type=ftype, lambda_fair=0.5)
        assert jnp.allclose(loss, ref, atol=1e-5, rtol=1e-5), (ftype, loss, ref)

    # --- multi-tile case (exercises accumulator across grid steps + padding) ---
    N2 = 260
    outputs2 = jax.random.normal(k_out2, (N2, C), dtype=jnp.float32)
    targets2 = jax.random.randint(k_tgt2, (N2,), 0, C, dtype=jnp.int32)
    protected2 = (jnp.arange(N2) % 3 == 0).astype(jnp.float32)

    for ftype in ('demographic_parity', 'equalized_odds'):
        loss = improved_fairness_loss(outputs2, targets2, protected2,
                                      fairness_type=ftype, lambda_fair=0.5,
                                      tile_n=128)
        loss = jax.block_until_ready(loss)
        ref = _reference_loss(outputs2, targets2, protected2,
                              fairness_type=ftype, lambda_fair=0.5)
        assert jnp.allclose(loss, ref, atol=1e-5, rtol=1e-5), (ftype, loss, ref)

    print("KERNEL_OK")
</pallas_src>

<mosaic_0001>
module attributes {stable_mosaic.version = 11 : i64} {
  func.func @_fairness_loss_kernel(%arg0: i32, %arg1: memref<4x128xf32, #tpu.memory_space<vmem>>, %arg2: memref<1x128xi32, #tpu.memory_space<vmem>>, %arg3: memref<1x128xi8, #tpu.memory_space<vmem>>, %arg4: memref<1x1xf32, #tpu.memory_space<vmem>>, %arg5: memref<8x128xf32, #tpu.memory_space<vmem>>) attributes {dimension_semantics = [#tpu.dimension_semantics<arbitrary>], iteration_bounds = array<i64: 1>, scalar_prefetch = 0 : i64, scratch_operands = 1 : i64, tpu.core_type = #tpu.core_type<tc>, window_params = [{transform_indices = @transform_0, window_bounds = array<i64: 4, 128>}, {transform_indices = @transform_1, window_bounds = array<i64: 1, 128>}, {transform_indices = @transform_2, window_bounds = array<i64: 1, 128>}, {pipeline_mode = #tpu.pipeline_mode<synchronous>, transform_indices = @transform_3, window_bounds = array<i64: 1, 1>}]} {
    %c0_i32 = arith.constant 0 : i32
    %0 = arith.cmpi eq, %arg0, %c0_i32 : i32
    %1 = arith.extui %0 : i1 to i32
    %c0_i32_0 = arith.constant 0 : i32
    %2 = arith.cmpi ne, %1, %c0_i32_0 : i32
    scf.if %2 {
      %cst_35 = arith.constant 0.000000e+00 : f32
      %80 = vector.broadcast %cst_35 : f32 to vector<8x128xf32>
      %c0_36 = arith.constant 0 : index
      %c0_37 = arith.constant 0 : index
      %81 = vector.load %arg5[%c0_36, %c0_37] : memref<8x128xf32, #tpu.memory_space<vmem>>, vector<8x128xf32>
      tpu.vector_store %arg5[%c0_36, %c0_37], %80 {strides = array<i32>} : memref<8x128xf32, #tpu.memory_space<vmem>>, vector<8x128xf32>,
    } else {
    }
    %c0 = arith.constant 0 : index
    %c0_1 = arith.constant 0 : index
    %3 = vector.load %arg1[%c0, %c0_1] : memref<4x128xf32, #tpu.memory_space<vmem>>, vector<4x128xf32>
    %c0_2 = arith.constant 0 : index
    %c0_3 = arith.constant 0 : index
    %4 = vector.load %arg2[%c0_2, %c0_3] : memref<1x128xi32, #tpu.memory_space<vmem>>, vector<1x128xi32>
    %c0_4 = arith.constant 0 : index
    %c0_5 = arith.constant 0 : index
    %5 = vector.load %arg3[%c0_4, %c0_5] : memref<1x128xi8, #tpu.memory_space<vmem>>, vector<1x128xi8>
    %6 = arith.sitofp %5 : vector<1x128xi8> to vector<1x128xf32>
    %7 = tpu.iota {dimensions = array<i32: 1>} : vector<1x128xi32>
    %c128_i32 = arith.constant 128 : i32
    %8 = arith.muli %arg0, %c128_i32 : i32
    %9 = vector.broadcast %8 : i32 to vector<1x128xi32>
    %10 = arith.addi %9, %7 : vector<1x128xi32>
    %c8_i32 = arith.constant 8 : i32
    %11 = vector.broadcast %c8_i32 : i32 to vector<1x128xi32>
    %12 = arith.cmpi slt, %10, %11 : vector<1x128xi32>
    %13 = arith.extui %12 : vector<1x128xi1> to vector<1x128xi32>
    %14 = arith.sitofp %13 : vector<1x128xi32> to vector<1x128xf32>
    %cst = arith.constant dense<0xFF800000> : vector<128xf32>
    %15 = vector.multi_reduction <maximumf>, %3, %cst [0] : vector<4x128xf32> to vector<128xf32>
    %16 = vector.shape_cast %15 : vector<128xf32> to vector<1x128xf32>
    %17 = vector.broadcast %16 : vector<1x128xf32> to vector<4x128xf32>
    %18 = arith.subf %3, %17 : vector<4x128xf32>
    %19 = math.exp %18 : vector<4x128xf32>
    %cst_6 = arith.constant dense<0.000000e+00> : vector<128xf32>
    %20 = vector.multi_reduction <add>, %19, %cst_6 [0] : vector<4x128xf32> to vector<128xf32>
    %21 = vector.shape_cast %20 : vector<128xf32> to vector<1x128xf32>
    %22 = math.log %21 : vector<1x128xf32>
    %23 = tpu.iota {dimensions = array<i32: 0>} : vector<4x128xi32>
    %24 = vector.broadcast %4 : vector<1x128xi32> to vector<4x128xi32>
    %25 = arith.cmpi eq, %23, %24 : vector<4x128xi32>
    %26 = arith.extui %25 : vector<4x128xi1> to vector<4x128xi32>
    %27 = arith.sitofp %26 : vector<4x128xi32> to vector<4x128xf32>
    %28 = arith.mulf %27, %3 : vector<4x128xf32>
    %cst_7 = arith.constant dense<0.000000e+00> : vector<128xf32>
    %29 = vector.multi_reduction <add>, %28, %cst_7 [0] : vector<4x128xf32> to vector<128xf32>
    %30 = vector.shape_cast %29 : vector<128xf32> to vector<1x128xf32>
    %31 = arith.addf %22, %16 : vector<1x128xf32>
    %32 = arith.subf %31, %30 : vector<1x128xf32>
    %33 = vector.extract_strided_slice %3 {offsets = [1, 0], sizes = [1, 128], strides = [1, 1]} : vector<4x128xf32> to vector<1x128xf32>
    %34 = arith.cmpf oge, %33, %16 : vector<1x128xf32>
    %35 = vector.extract_strided_slice %3 {offsets = [0, 0], sizes = [1, 128], strides = [1, 1]} : vector<4x128xf32> to vector<1x128xf32>
    %36 = arith.cmpf olt, %35, %16 : vector<1x128xf32>
    %37 = arith.andi %34, %36 : vector<1x128xi1>
    %38 = arith.extui %37 : vector<1x128xi1> to vector<1x128xi32>
    %39 = arith.sitofp %38 : vector<1x128xi32> to vector<1x128xf32>
    %40 = arith.mulf %6, %14 : vector<1x128xf32>
    %41 = arith.mulf %39, %14 : vector<1x128xf32>
    %c1_i32 = arith.constant 1 : i32
    %42 = vector.broadcast %c1_i32 : i32 to vector<1x128xi32>
    %43 = arith.cmpi eq, %4, %42 : vector<1x128xi32>
    %44 = arith.extui %43 : vector<1x128xi1> to vector<1x128xi32>
    %45 = arith.sitofp %44 : vector<1x128xi32> to vector<1x128xf32>
    %46 = arith.mulf %45, %14 : vector<1x128xf32>
    %47 = arith.mulf %32, %14 : vector<1x128xf32>
    %48 = arith.mulf %41, %6 : vector<1x128xf32>
    %49 = arith.mulf %41, %45 : vector<1x128xf32>
    %50 = arith.mulf %40, %45 : vector<1x128xf32>
    %51 = arith.mulf %41, %6 : vector<1x128xf32>
    %52 = arith.mulf %51, %45 : vector<1x128xf32>
    %c0_8 = arith.constant 0 : index
    %c0_9 = arith.constant 0 : index
    %53 = vector.load %arg5[%c0_8, %c0_9] : memref<8x128xf32, #tpu.memory_space<vmem>>, vector<1x128xf32>
    %54 = arith.addf %53, %47 : vector<1x128xf32>
    %c0_10 = arith.constant 0 : index
    %c0_11 = arith.constant 0 : index
    %55 = vector.load %arg5[%c0_10, %c0_11] : memref<8x128xf32, #tpu.memory_space<vmem>>, vector<1x128xf32>
    tpu.vector_store %arg5[%c0_10, %c0_11], %54 {strides = array<i32>} : memref<8x128xf32, #tpu.memory_space<vmem>>, vector<1x128xf32>,
    %c1 = arith.constant 1 : index
    %c0_12 = arith.constant 0 : index
    %56 = vector.load %arg5[%c1, %c0_12] : memref<8x128xf32, #tpu.memory_space<vmem>>, vector<1x128xf32>
    %57 = arith.addf %56, %41 : vector<1x128xf32>
    %c1_13 = arith.constant 1 : index
    %c0_14 = arith.constant 0 : index
    %58 = vector.load %arg5[%c1_13, %c0_14] : memref<8x128xf32, #tpu.memory_space<vmem>>, vector<1x128xf32>
    tpu.vector_store %arg5[%c1_13, %c0_14], %57 {strides = array<i32>} : memref<8x128xf32, #tpu.memory_space<vmem>>, vector<1x128xf32>,
    %c2 = arith.constant 2 : index
    %c0_15 = arith.constant 0 : index
    %59 = vector.load %arg5[%c2, %c0_15] : memref<8x128xf32, #tpu.memory_space<vmem>>, vector<1x128xf32>
    %60 = arith.addf %59, %40 : vector<1x128xf32>
    %c2_16 = arith.constant 2 : index
    %c0_17 = arith.constant 0 : index
    %61 = vector.load %arg5[%c2_16, %c0_17] : memref<8x128xf32, #tpu.memory_space<vmem>>, vector<1x128xf32>
    tpu.vector_store %arg5[%c2_16, %c0_17], %60 {strides = array<i32>} : memref<8x128xf32, #tpu.memory_space<vmem>>, vector<1x128xf32>,
    %c3 = arith.constant 3 : index
    %c0_18 = arith.constant 0 : index
    %62 = vector.load %arg5[%c3, %c0_18] : memref<8x128xf32, #tpu.memory_space<vmem>>, vector<1x128xf32>
    %63 = arith.addf %62, %48 : vector<1x128xf32>
    %c3_19 = arith.constant 3 : index
    %c0_20 = arith.constant 0 : index
    %64 = vector.load %arg5[%c3_19, %c0_20] : memref<8x128xf32, #tpu.memory_space<vmem>>, vector<1x128xf32>
    tpu.vector_store %arg5[%c3_19, %c0_20], %63 {strides = array<i32>} : memref<8x128xf32, #tpu.memory_space<vmem>>, vector<1x128xf32>,
    %c4 = arith.constant 4 : index
    %c0_21 = arith.constant 0 : index
    %65 = vector.load %arg5[%c4, %c0_21] : memref<8x128xf32, #tpu.memory_space<vmem>>, vector<1x128xf32>
    %66 = arith.addf %65, %46 : vector<1x128xf32>
    %c4_22 = arith.constant 4 : index
    %c0_23 = arith.constant 0 : index
    %67 = vector.load %arg5[%c4_22, %c0_23] : memref<8x128xf32, #tpu.memory_space<vmem>>, vector<1x128xf32>
    tpu.vector_store %arg5[%c4_22, %c0_23], %66 {strides = array<i32>} : memref<8x128xf32, #tpu.memory_space<vmem>>, vector<1x128xf32>,
    %c5 = arith.constant 5 : index
    %c0_24 = arith.constant 0 : index
    %68 = vector.load %arg5[%c5, %c0_24] : memref<8x128xf32, #tpu.memory_space<vmem>>, vector<1x128xf32>
    %69 = arith.addf %68, %49 : vector<1x128xf32>
    %c5_25 = arith.constant 5 : index
    %c0_26 = arith.constant 0 : index
    %70 = vector.load %arg5[%c5_25, %c0_26] : memref<8x128xf32, #tpu.memory_space<vmem>>, vector<1x128xf32>
    tpu.vector_store %arg5[%c5_25, %c0_26], %69 {strides = array<i32>} : memref<8x128xf32, #tpu.memory_space<vmem>>, vector<1x128xf32>,
    %c6 = arith.constant 6 : index
    %c0_27 = arith.constant 0 : index
    %71 = vector.load %arg5[%c6, %c0_27] : memref<8x128xf32, #tpu.memory_space<vmem>>, vector<1x128xf32>
    %72 = arith.addf %71, %50 : vector<1x128xf32>
    %c6_28 = arith.constant 6 : index
    %c0_29 = arith.constant 0 : index
    %73 = vector.load %arg5[%c6_28, %c0_29] : memref<8x128xf32, #tpu.memory_space<vmem>>, vector<1x128xf32>
    tpu.vector_store %arg5[%c6_28, %c0_29], %72 {strides = array<i32>} : memref<8x128xf32, #tpu.memory_space<vmem>>, vector<1x128xf32>,
    %c7 = arith.constant 7 : index
    %c0_30 = arith.constant 0 : index
    %74 = vector.load %arg5[%c7, %c0_30] : memref<8x128xf32, #tpu.memory_space<vmem>>, vector<1x128xf32>
    %75 = arith.addf %74, %52 : vector<1x128xf32>
    %c7_31 = arith.constant 7 : index
    %c0_32 = arith.constant 0 : index
    %76 = vector.load %arg5[%c7_31, %c0_32] : memref<8x128xf32, #tpu.memory_space<vmem>>, vector<1x128xf32>
    tpu.vector_store %arg5[%c7_31, %c0_32], %75 {strides = array<i32>} : memref<8x128xf32, #tpu.memory_space<vmem>>, vector<1x128xf32>,
    %c0_i32_33 = arith.constant 0 : i32
    %77 = arith.cmpi eq, %arg0, %c0_i32_33 : i32
    %78 = arith.extui %77 : i1 to i32
    %c0_i32_34 = arith.constant 0 : i32
    %79 = arith.cmpi ne, %78, %c0_i32_34 : i32
    scf.if %79 {
      %c0_35 = arith.constant 0 : index
      %c0_36 = arith.constant 0 : index
      %80 = vector.load %arg5[%c0_35, %c0_36] : memref<8x128xf32, #tpu.memory_space<vmem>>, vector<8x128xf32>
      %cst_37 = arith.constant dense<0.000000e+00> : vector<8xf32>
      %81 = vector.multi_reduction <add>, %80, %cst_37 [1] : vector<8x128xf32> to vector<8xf32>
      %82 = vector.shape_cast %81 : vector<8xf32> to vector<8x1xf32>
      %83 = vector.extract_strided_slice %82 {offsets = [0, 0], sizes = [1, 1], strides = [1, 1]} : vector<8x1xf32> to vector<1x1xf32>
      %84 = vector.extract_strided_slice %82 {offsets = [1, 0], sizes = [1, 1], strides = [1, 1]} : vector<8x1xf32> to vector<1x1xf32>
      %85 = vector.extract_strided_slice %82 {offsets = [2, 0], sizes = [1, 1], strides = [1, 1]} : vector<8x1xf32> to vector<1x1xf32>
      %86 = vector.extract_strided_slice %82 {offsets = [3, 0], sizes = [1, 1], strides = [1, 1]} : vector<8x1xf32> to vector<1x1xf32>
      %cst_38 = arith.constant 1.250000e-01 : f32
      %87 = vector.broadcast %cst_38 : f32 to vector<1x1xf32>
      %88 = arith.mulf %83, %87 : vector<1x1xf32>
      %cst_39 = arith.constant 8.000000e+00 : f32
      %89 = vector.broadcast %cst_39 : f32 to vector<1x1xf32>
      %90 = arith.subf %89, %85 : vector<1x1xf32>
      %91 = arith.subf %84, %86 : vector<1x1xf32>
      %cst_40 = arith.constant 0.000000e+00 : f32
      %92 = vector.broadcast %cst_40 : f32 to vector<1x1xf32>
      %93 = arith.cmpf ogt, %85, %92 : vector<1x1xf32>
      %cst_41 = arith.constant 1.000000e+00 : f32
      %94 = vector.broadcast %cst_41 : f32 to vector<1x1xf32>
      %95 = arith.select %93, %85, %94 : vector<1x1xi1>, vector<1x1xf32>
      %96 = tpu.reciprocal %95 : vector<1x1xf32> -> vector<1x1xf32>
      %cst_42 = arith.constant 0.000000e+00 : f32
      %97 = vector.broadcast %cst_42 : f32 to vector<1x1xf32>
      %98 = arith.cmpf ogt, %85, %97 : vector<1x1xf32>
      %99 = arith.mulf %86, %96 : vector<1x1xf32>
      %cst_43 = arith.constant 0.000000e+00 : f32
      %100 = vector.broadcast %cst_43 : f32 to vector<1x1xf32>
      %101 = arith.select %98, %99, %100 : vector<1x1xi1>, vector<1x1xf32>
      %cst_44 = arith.constant 0.000000e+00 : f32
      %102 = vector.broadcast %cst_44 : f32 to vector<1x1xf32>
      %103 = arith.cmpf ogt, %90, %102 : vector<1x1xf32>
      %cst_45 = arith.constant 1.000000e+00 : f32
      %104 = vector.broadcast %cst_45 : f32 to vector<1x1xf32>
      %105 = arith.select %103, %90, %104 : vector<1x1xi1>, vector<1x1xf32>
      %106 = tpu.reciprocal %105 : vector<1x1xf32> -> vector<1x1xf32>
      %cst_46 = arith.constant 0.000000e+00 : f32
      %107 = vector.broadcast %cst_46 : f32 to vector<1x1xf32>
      %108 = arith.cmpf ogt, %90, %107 : vector<1x1xf32>
      %109 = arith.mulf %91, %106 : vector<1x1xf32>
      %cst_47 = arith.constant 0.000000e+00 : f32
      %110 = vector.broadcast %cst_47 : f32 to vector<1x1xf32>
      %111 = arith.select %108, %109, %110 : vector<1x1xi1>, vector<1x1xf32>
      %112 = arith.subf %101, %111 : vector<1x1xf32>
      %113 = math.absf %112 : vector<1x1xf32>
      %cst_48 = arith.constant 0.000000e+00 : f32
      %114 = vector.broadcast %cst_48 : f32 to vector<1x1xf32>
      %115 = arith.cmpf ogt, %85, %114 : vector<1x1xf32>
      %cst_49 = arith.constant 0.000000e+00 : f32
      %116 = vector.broadcast %cst_49 : f32 to vector<1x1xf32>
      %117 = arith.cmpf ogt, %90, %116 : vector<1x1xf32>
      %118 = arith.andi %115, %117 : vector<1x1xi1>
      %cst_50 = arith.constant 5.000000e-01 : f32
      %119 = vector.broadcast %cst_50 : f32 to vector<1x1xf32>
      %120 = arith.mulf %119, %113 : vector<1x1xf32>
      %cst_51 = arith.constant 0.000000e+00 : f32
      %121 = vector.broadcast %cst_51 : f32 to vector<1x1xf32>
      %122 = arith.select %118, %120, %121 : vector<1x1xi1>, vector<1x1xf32>
      %123 = arith.addf %88, %122 : vector<1x1xf32>
      %c0_52 = arith.constant 0 : index
      %c0_53 = arith.constant 0 : index
      %124 = vector.load %arg4[%c0_52, %c0_53] : memref<1x1xf32, #tpu.memory_space<vmem>>, vector<1x1xf32>
      tpu.vector_store %arg4[%c0_52, %c0_53], %123 {strides = array<i32>} : memref<1x1xf32, #tpu.memory_space<vmem>>, vector<1x1xf32>,
    } else {
    }
    return
  }
  func.func @transform_0(%arg0: i32) -> (i32, i32) {
    %c0_i32 = arith.constant 0 : i32
    %c0_i32_0 = arith.constant 0 : i32
    return %c0_i32, %arg0 : i32, i32
  }
  func.func @transform_1(%arg0: i32) -> (i32, i32) {
    %c0_i32 = arith.constant 0 : i32
    %c0_i32_0 = arith.constant 0 : i32
    return %c0_i32, %arg0 : i32, i32
  }
  func.func @transform_2(%arg0: i32) -> (i32, i32) {
    %c0_i32 = arith.constant 0 : i32
    %c0_i32_0 = arith.constant 0 : i32
    return %c0_i32, %arg0 : i32, i32
  }
  func.func @transform_3(%arg0: i32) -> (i32, i32) {
    %c0_i32 = arith.constant 0 : i32
    %c0_i32_0 = arith.constant 0 : i32
    %c0_i32_1 = arith.constant 0 : i32
    return %c0_i32, %c0_i32_0 : i32, i32
  }
}

</mosaic_0001>

<bundles_post_ra>
// kernel: tpu_custom_call.1
= control target key start
LH: loop header
LB: loop body
LE: loop exit
PB: predicated region body
PF: predicated region fallthrough
CT: control target
= control target key end

     0   :  { %8 = vsyncpa [#allocation4], 0  ;;  %s341_s0 = inlined_call_operand.hbm [shape: f32[4,128], index: 0, kind: input, shape index: {}]   ;;  %s342_s1 = inlined_call_operand.vmem [shape: s32[1,128], index: 1, kind: input, shape index: {}]   ;;  %s343_s2 = inlined_call_operand.vmem [shape: s8[1,128], index: 2, kind: input, shape index: {}]   ;;  %s344_s3 = inlined_call_operand.hbm [shape: f32[1,1], index: 3, kind: output, shape index: {}]  }
   0x1   :  { %9 = vsyncpa [#allocation5], 0  ;;  %s271_s12 = smov [#allocation3]  }
   0x2   :  { %s16_s13 = sshll.u32 %s271_s12, 4  ;;  %s17_s13 = int_to_ptr.vmem [resolvable:$true] %s16_s13 }
   0x3   :  { %s235_s14 = scalar_lea.vmem %s17_s13, 64  ;;  %p240_p1 = scmp.lt.s32.totalorder %s17_s13, %s17_s13 }
   0x4   :  { %p236_p0 = scmp.ne.s32.totalorder %s17_s13, %s235_s14  ;;  %p241_p2 = scmp.lt.s32.totalorder %s235_s14, %s235_s14 }
   0x6   :  { %p242_p3 = por %p241_p2, %p240_p1 }
   0x8   :  { %p243_p4 = pnand %p242_p3, %p236_p0 }
   0xa   :  { %246 = shalt.err (!%p243_p4)
}
   0xb   :  { %19 = dma.hbm_to_vmem [thread:$0]  %s341_s0, 64, %s17_s13, [#allocation4]  }
   0xc   :  { %267 = dma.done.wait [#allocation4], 64  }
   0xd   :  { %268 = vsyncadd [#allocation4], 4294967232  ;;  %v37_v0 = vlaneseq  ;;  %v272_v1 = vmov 0.0   ;;  %vm45_vm0 = vcmask 1043456   ;;  %v299_v3 = vld [vmem:[#allocation3] sm:$0xf] }
   0xe   :  { %31 = vst [vmem:[#allocation2] sm:$0xff] %v272_v1  ;;  %v33_v4 = vld [vmem:[%s342_s1] sm:$0x1]  ;;  %v46_v7 = vsel %vm45_vm0, %v299_v3, -inf  ;;  %v273_v28 = vmov 0   ;;  %s274_s0 = smov [#allocation6]  }
   0xf   :  { %v38_v2 = vand.u32 127, %v37_v0  ;;  %v34_v5 = vld [vmem:[%s343_s2] sm:$0x1]  ;;  %vm94_vm2 = vcmp.eq.s32.totalorder %v33_v4, 1  ;;  %v47_v9 = vrot.slane %v46_v7, 4  ;;  %v66_v26 = vshrl.u32 %v37_v0, 7 }
  0x10   :  { %v35_v6 = vunpack.c.0.s8 %v34_v5  ;;  %v214_v10 = vsel %vm94_vm2, 1.0, %v272_v1  ;;  %s202_s1 = sshll.u32 %s274_s0, 4  ;;  %vm194_vm11 = vcmask 0   ;;  %s203_s1 = int_to_ptr.vmem [resolvable:$true] %s202_s1 }
  0x11   :  { %vm42_vm1 = vcmp.lt.s32.totalorder %v38_v2, 8  ;;  %v48_v14 = vmax.f32 %v46_v7, %v47_v9  ;;  %v69_v32 = vsub.s32 0, %v66_v26  ;;  %s247_s2 = scalar_lea.vmem %s203_s1, 16  ;;  %s251_s21 = scalar_lea.vmem %s203_s1, 32 }
  0x12   :  { %v310_v8 = vsel %vm42_vm1, 1.0, %v272_v1  ;;  %v36_v11 = vcvt.s32.f32 %v35_v6  ;;  %p248_p5 = scmp.ne.s32.totalorder %s203_s1, %s247_s2  ;;  %p252_p6 = scmp.lt.s32.totalorder %s203_s1, %s203_s1 }
  0x13   :  { %v97_v12 = vmul.f32 %v214_v10, %v310_v8  ;;  %v49_v18 = vrot.slane %v48_v14, 2  ;;  %v110_v34 = vrot.slane %v214_v10, %v69_v32  ;;  %v70_v37 = vrot.slane %v33_v4, %v69_v32  ;;  %p253_p7 = scmp.lt.s32.totalorder %s251_s21, %s247_s2 }
  0x14   :  { %v92_v16 = vmul.f32 %v310_v8, %v36_v11  ;;  %v103_v33 = vrot.slane %v36_v11, %v69_v32 }
  0x15   :  { %v133_v13 = vld [vmem:[#allocation2 + $0x4] sm:$0x1]  ;;  %v124_v15 = vld [vmem:[#allocation2 + $0x2] sm:$0x1]  ;;  %v142_v19 = vld [vmem:[#allocation2 + $0x6] sm:$0x1]  ;;  %v50_v22 = vmax.f32 %v48_v14, %v49_v18  ;;  %vm71_vm7 = vcmp.eq.s32.totalorder %v66_v26, %v70_v37  ;;  %p254_p8 = por %p253_p7, %p252_p6 }
  0x16   :  { %v134_v17 = vadd.f32 %v133_v13, %v97_v12  ;;  %v113_v20 = vmul.f32 %v214_v10, %v92_v16  ;;  %v125_v21 = vadd.f32 %v124_v15, %v92_v16  ;;  %v118_v38 = vld [vmem:[#allocation2 + $0x1] sm:$0x1]  ;;  %v127_v42 = vld [vmem:[#allocation2 + $0x3] sm:$0x1]  ;;  %v136_v43 = vld [vmem:[#allocation2 + $0x5] sm:$0x1] }
  0x17   :  { %v51_v24 = vrot.slane %v50_v22, 1  ;;  %v145_v48 = vld [vmem:[#allocation2 + $0x7] sm:$0x1]  ;;  %v212_v52 = vsel %vm71_vm7, 1.0, %v272_v1  ;;  %p255_p9 = pnand %p254_p8, %p248_p5 }
  0x18   :  { %135 = vst [vmem:[#allocation2 + $0x4] sm:$0x1] %v134_v17  ;;  %126 = vst [vmem:[#allocation2 + $0x2] sm:$0x1] %v125_v21  ;;  %v143_v23 = vadd.f32 %v142_v19, %v113_v20  ;;  %v74_v56 = vmul.f32 %v212_v52, %v299_v3 }
  0x19   :  { %v52_v25 = vmax.f32 %v50_v22, %v51_v24 }
  0x1a   :  { %144 = vst [vmem:[#allocation2 + $0x6] sm:$0x1] %v143_v23  ;;  %v75_v59 = vsel %vm45_vm0, %v74_v56, 0.0 }
  0x1b   :  { %v53_v27 = vsub.f32 %v299_v3, %v52_v25  ;;  %vm85_vm3 = vcmp.lt.f32.partialorder %v299_v3, %v52_v25  ;;  %vm84_vm4 = vcmp.ge.f32.partialorder %v299_v3, %v52_v25  ;;  %v76_v62 = vrot.slane %v75_v59, 4  ;;  %v115_v3 = vld [vmem:[#allocation2] sm:$0x1] }
  0x1c   :  { %v86_v29 = vsel %vm85_vm3, 1, %v273_v28 }
  0x1d   :  { %v54_v30 = vmul.f32 1.442695, %v53_v27  ;;  %v87_v31 = vrot.slane %v86_v29, 7  ;;  %v77_v2 = vadd.f32 %v76_v62, %v75_v59 }
  0x1f   :  { %219 = vpow2.f32 %v54_v30  ;;  %vm88_vm5 = vcmp.ne.s32.totalorder %v87_v31, 0 }
  0x20   :  { %vm89_vm6 = vmand %vm84_vm4, %vm88_vm5 }
  0x21   :  { %v213_v35 = vsel %vm89_vm6, 1.0, %v272_v1  ;;  %v78_v1 = vrot.slane %v77_v2, 2 }
  0x22   :  { %v93_v36 = vmul.f32 %v213_v35, %v310_v8 }
  0x23   :  { %v79_v4 = vadd.f32 %v78_v1, %v77_v2 }
  0x24   :  { %v105_v39 = vmul.f32 %v103_v33, %v93_v36  ;;  %v112_v40 = vmul.f32 %v110_v34, %v93_v36  ;;  %v120_v41 = vrot.slane %v93_v36, 1 }
  0x25   :  { %v80_v5 = vrot.slane %v79_v4, 1 }
  0x26   :  { %v114_v44 = vmul.f32 %v110_v34, %v105_v39  ;;  %v122_v45 = vadd.f32 %v120_v41, %v118_v38  ;;  %v129_v46 = vrot.slane %v105_v39, 1  ;;  %v138_v47 = vrot.slane %v112_v40, 1 }
  0x27   :  { %v81_v9 = vadd.f32 %v80_v5, %v79_v4 }
  0x28   :  { %123 = vst [vmem:[#allocation2 + $0x1] sm:$0x1] %v122_v45  ;;  %v131_v49 = vadd.f32 %v129_v46, %v127_v42  ;;  %v140_v50 = vadd.f32 %v138_v47, %v136_v43  ;;  %v147_v51 = vrot.slane %v114_v44, 1 }
  0x2a   :  { %132 = vst [vmem:[#allocation2 + $0x3] sm:$0x1] %v131_v49  ;;  %141 = vst [vmem:[#allocation2 + $0x5] sm:$0x1] %v140_v50  ;;  %v149_v53 = vadd.f32 %v147_v51, %v145_v48 }
  0x2c   :  { %v220_v54 = vpop.eup %219  ;;  %150 = vst [vmem:[#allocation2 + $0x7] sm:$0x1] %v149_v53 }
  0x2d   :  { %v56_v55 = vsel %vm45_vm0, %v220_v54, 0.0 }
  0x2e   :  { %v57_v57 = vrot.slane %v56_v55, 4 }
  0x30   :  { %v58_v58 = vadd.f32 %v57_v57, %v56_v55 }
  0x32   :  { %v59_v60 = vrot.slane %v58_v58, 2 }
  0x34   :  { %v60_v61 = vadd.f32 %v59_v60, %v58_v58 }
  0x36   :  { %v61_v63 = vrot.slane %v60_v61, 1 }
  0x38   :  { %v62_v0 = vadd.f32 %v61_v63, %v60_v61 }
  0x3a   :  { %221 = vlog2.f32 %v62_v0 }
  0x47   :  { %v222_v6 = vpop.eup %221 }
  0x48   :  { %v64_v7 = vmul.f32 0.6931472, %v222_v6 }
  0x4a   :  { %v82_v10 = vadd.f32 %v64_v7, %v52_v25 }
  0x4c   :  { %v83_v11 = vsub.f32 %v82_v10, %v81_v9 }
  0x4e   :  { %v98_v12 = vmul.f32 %v310_v8, %v83_v11 }
  0x50   :  { %v116_v13 = vadd.f32 %v115_v3, %v98_v12 }
  0x52   :  { %117 = vst [vmem:[#allocation2] sm:$0x1] %v116_v13 }
  0x59   :  { %v154_v14 = vld [vmem:[#allocation2] sm:$0xff] }
  0x5a   :  { %155 = vadd.xlane.f32.xlu0 %v154_v14 }
  0xe3   :  { %v156_v15 = vpop.xlane.xlu0 %155 }
  0xe4   :  { %v158_v16 = vsub.f32 8.0, %v156_v15  ;;  %vm163_vm8 = vcmp.gt.f32.partialorder %v156_v15, 0.0  ;;  %v160_v20 = vrot.slane %v156_v15, 2  ;;  %v157_v35 = vmul.f32 0.125, %v156_v15 }
  0xe5   :  { %v164_v17 = vsel %vm163_vm8, %v156_v15, 1.0 }
  0xe6   :  { %223 = vrcp.f32 %v164_v17  ;;  %vm326_vm9 = vcmp.gt.f32.partialorder %v158_v16, 0.0  ;;  %v162_v23 = vsub.f32 %v156_v15, %v160_v20 }
  0xe7   :  { %v175_v19 = vsel %vm326_vm9, %v158_v16, 1.0  ;;  %vm187_vm10 = vmand %vm163_vm8, %vm326_vm9 }
  0xe8   :  { %225 = vrcp.f32 %v175_v19 }
  0xf3   :  { %v224_v8 = vpop.eup %223 }
  0xf4   :  { %v167_v21 = vrot.slane %v224_v8, 7 }
  0xf5   :  { %v226_v22 = vpop.eup %225 }
  0xf6   :  { %v169_v24 = vmul.f32 %v167_v21, %v156_v15  ;;  %v178_v25 = vrot.slane %v226_v22, 1 }
  0xf8   :  { %v171_v26 = vrot.slane %v169_v24, 1  ;;  %v180_v27 = vmul.f32 %v178_v25, %v162_v23 }
  0xfa   :  { %v182_v28 = vrot.slane %v180_v27, 7  ;;  %v173_v29 = vsel %vm163_vm8, %v171_v26, 0.0 }
  0xfc   :  { %v184_v30 = vsel %vm326_vm9, %v182_v28, 0.0 }
  0xfd   :  { %v185_v31 = vsub.f32 %v173_v29, %v184_v30 }
  0xff   :  { %v186_v32 = vand.u32 2147483647, %v185_v31 }
 0x101   :  { %v188_v33 = vmul.f32 0.5, %v186_v32 }
 0x103   :  { %v189_v34 = vsel %vm187_vm10, %v188_v33, 0.0 }
 0x104   :  { %v191_v36 = vrot.slane %v189_v34, 2 }
 0x106   :  { %v193_v37 = vadd.f32 %v191_v36, %v157_v35 }
 0x108   :  { %195 = vst.msk [vmem:[#allocation6] sm:$0x1] %vm194_vm11, %v193_v37 }
 0x109   :  { %258 = shalt.err (!%p255_p9)
}
 0x10a   :  { %205 = dma.vmem_to_hbm [thread:$0]  %s203_s1, 16, %s344_s3, [#allocation5]  }
 0x10b   :  { %269 = dma.done.wait [#allocation5], 16  }
 0x10c   :  { %270 = vsyncadd [#allocation5], 4294967280 }
 0x10d   :  { %209 = vsyncpa [#allocation4], 1 }
 0x10e   :  { %210 = vsyncpa [#allocation5], 1 }

</bundles_post_ra>
